<compile_context>
chip_gen: v7x
topology: tpu7x:2x2x1
jax: 0.10.0
libtpu: 0.0.40
codegen_flags: <defaults>
</compile_context>

<pallas_src>
import functools

import jax
import jax.numpy as jnp
from jax.experimental import pallas as pl
from jax.experimental.pallas import tpu as pltpu


def _convlstm_kernel(patches_ref, w_ref, b_ref, c_ref, h_out_ref, c_out_ref,
                     *, hidden_dim):
    """One grid step = one batch element, fully lane-dense.

    patches_ref : (1, K, N)        im2col of concat([x, h_cur]); N = H*W
    w_ref       : (4*hidden, K)
    b_ref       : (4*hidden, 1)
    c_ref       : (1, hidden, N)
    h_out_ref   : (1, hidden, N)
    c_out_ref   : (1, hidden, N)
    """
    hd = hidden_dim

    # Single MXU matmul (K ~ 108 nearly fills the contraction depth);
    # accumulation is always f32 regardless of operand dtype.
    acc = jnp.dot(w_ref[...], patches_ref[0],
                  preferred_element_type=jnp.float32)            # (4*hd, N)
    acc = acc + b_ref[...]                                       # lane-broadcast bias

    # One EUP slab for the three sigmoid gates, one for tanh(g).
    ifo = jax.nn.sigmoid(acc[:3 * hd, :])                        # (3*hd, N)
    i = ifo[0 * hd:1 * hd, :]
    f = ifo[1 * hd:2 * hd, :]
    o = ifo[2 * hd:3 * hd, :]
    g = jnp.tanh(acc[3 * hd:4 * hd, :])                          # (hd, N)

    c_cur = c_ref[0].astype(jnp.float32)                         # (hd, N)
    c_next = f * c_cur + i * g
    h_next = o * jnp.tanh(c_next)

    h_out_ref[0] = h_next.astype(h_out_ref.dtype)
    c_out_ref[0] = c_next.astype(c_out_ref.dtype)


@functools.partial(jax.jit, static_argnames=("matmul_dtype",))
def convlstm_cell_pallas(x, h_cur, c_cur, w_oihw, bias,
                         matmul_dtype=jnp.float32):
    """ConvLSTMCell forward, NCHW in / NCHW out (matches the torch module).

    x      : (B, Cx, H, W)
    h_cur  : (B, hidden, H, W)
    c_cur  : (B, hidden, H, W)
    w_oihw : (4*hidden, Cx+hidden, kh, kw)   -- torch Conv2d weight layout
    bias   : (4*hidden,)
    matmul_dtype: jnp.float32 (exact) or jnp.bfloat16 (v6e/v7x MXU fast path;
                  accumulation + gate math stay f32).
    """
    B, _, H, W = x.shape
    hd = h_cur.shape[1]
    four_hd, cin, kh, kw = w_oihw.shape
    ph, pw = kh // 2, kw // 2
    K = kh * kw * cin
    N = H * W

    # --- wrapper-side im2col (cheap layout plumbing, fused under jit) -------
    combined = jnp.concatenate([x, h_cur], axis=1)               # (B, cin, H, W)
    padded = jnp.pad(combined, ((0, 0), (0, 0), (ph, ph), (pw, pw)))
    taps = [padded[:, :, dy:dy + H, dx:dx + W]
            for dy in range(kh) for dx in range(kw)]             # kh*kw x (B,cin,H,W)
    patches = jnp.stack(taps, axis=1).reshape(B, K, N).astype(matmul_dtype)

    # (4*hd, K) with K ordered (tap, cin), matching `patches`.
    w_mat = jnp.transpose(w_oihw, (0, 2, 3, 1)).reshape(four_hd, K)
    w_mat = w_mat.astype(matmul_dtype)
    bias2d = bias.reshape(four_hd, 1).astype(jnp.float32)
    c_flat = c_cur.reshape(B, hd, N).astype(jnp.float32)

    kernel = functools.partial(_convlstm_kernel, hidden_dim=hd)

    h_flat, c_next_flat = pl.pallas_call(
        kernel,
        out_shape=(jax.ShapeDtypeStruct((B, hd, N), jnp.float32),
                   jax.ShapeDtypeStruct((B, hd, N), jnp.float32)),
        grid=(B,),
        in_specs=[
            pl.BlockSpec((1, K, N), lambda b: (b, 0, 0)),        # im2col patches
            pl.BlockSpec((four_hd, K), lambda b: (0, 0)),        # weights
            pl.BlockSpec((four_hd, 1), lambda b: (0, 0)),        # bias
            pl.BlockSpec((1, hd, N), lambda b: (b, 0, 0)),       # c_cur
        ],
        out_specs=(
            pl.BlockSpec((1, hd, N), lambda b: (b, 0, 0)),       # h_next
            pl.BlockSpec((1, hd, N), lambda b: (b, 0, 0)),       # c_next
        ),
        # c_cur (input 3) is updated in place into c_next (output 1).
        input_output_aliases={3: 1},
        compiler_params=pltpu.CompilerParams(
            dimension_semantics=("parallel",)),
    )(patches, w_mat, bias2d, c_flat)

    h_next = h_flat.reshape(B, hd, H, W).astype(x.dtype)
    c_next = c_next_flat.reshape(B, hd, H, W).astype(x.dtype)
    return h_next, c_next


def convlstm_cell_reference(x, h_cur, c_cur, w_oihw, bias):
    """Pure-JAX reference matching torch ConvLSTMCell.forward (NCHW layout)."""
    kh, kw = w_oihw.shape[2], w_oihw.shape[3]
    hd = h_cur.shape[1]
    combined = jnp.concatenate([x, h_cur], axis=1)
    conv = jax.lax.conv_general_dilated(
        combined, w_oihw, window_strides=(1, 1),
        padding=[(kh // 2, kh // 2), (kw // 2, kw // 2)],
        dimension_numbers=("NCHW", "OIHW", "NCHW"),
        precision=jax.lax.Precision.HIGHEST)
    conv = conv + bias[None, :, None, None]
    cc_i, cc_f, cc_o, cc_g = jnp.split(conv, 4, axis=1)
    i = jax.nn.sigmoid(cc_i)
    f = jax.nn.sigmoid(cc_f)
    o = jax.nn.sigmoid(cc_o)
    g = jnp.tanh(cc_g)
    c_next = f * c_cur + i * g
    h_next = o * jnp.tanh(c_next)
    return h_next, c_next


if __name__ == "__main__":
    # Small ConvLSTMCell config (MSCRED uses 3x3 kernels).
    batch, input_dim, hidden_dim = 2, 4, 8
    height = width = 16
    kh, kw = 3, 3
    cin = input_dim + hidden_dim

    key = jax.random.PRNGKey(0)
    kx, kw_key, kb, kh_key, kc_key = jax.random.split(key, 5)

    # PyTorch-layout (NCHW) inputs; nonzero state to exercise the recurrence.
    x = jax.random.normal(kx, (batch, input_dim, height, width), jnp.float32)
    h_cur = 0.1 * jax.random.normal(
        kh_key, (batch, hidden_dim, height, width), jnp.float32)
    c_cur = 0.1 * jax.random.normal(
        kc_key, (batch, hidden_dim, height, width), jnp.float32)

    # Deterministic synthetic conv parameters, torch Conv2d layout (O,I,kh,kw).
    fan_in = cin * kh * kw
    w_oihw = (jax.random.normal(kw_key, (4 * hidden_dim, cin, kh, kw),
                                jnp.float32) / jnp.sqrt(fan_in))
    bias = 0.01 * jax.random.normal(kb, (4 * hidden_dim,), jnp.float32)

    h_ref, c_ref = convlstm_cell_reference(x, h_cur, c_cur, w_oihw, bias)

    # f32 MXU operands: faithful to the module, checked tight.
    h_next, c_next = convlstm_cell_pallas(x, h_cur, c_cur, w_oihw, bias)
    jax.block_until_ready((h_next, c_next))
    assert jnp.allclose(h_next, h_ref, atol=1e-5, rtol=1e-5), "h mismatch (f32)"
    assert jnp.allclose(c_next, c_ref, atol=1e-5, rtol=1e-5), "c mismatch (f32)"

    # bf16 MXU operands (v6e/v7x fast path): f32 accumulation + f32 gate math,
    # so only operand rounding (~1e-3) separates it from the f32 reference.
    h_bf, c_bf = convlstm_cell_pallas(x, h_cur, c_cur, w_oihw, bias,
                                      matmul_dtype=jnp.bfloat16)
    jax.block_until_ready((h_bf, c_bf))
    assert jnp.allclose(h_bf, h_ref, atol=3e-2, rtol=3e-2), "h mismatch (bf16)"
    assert jnp.allclose(c_bf, c_ref, atol=3e-2, rtol=3e-2), "c mismatch (bf16)"

    print("KERNEL_OK")
</pallas_src>

<mosaic_0001>
module attributes {stable_mosaic.version = 11 : i64} {
  func.func @_convlstm_kernel(%arg0: i32, %arg1: memref<1x108x256xf32, #tpu.memory_space<vmem>>, %arg2: memref<32x108xf32, #tpu.memory_space<vmem>>, %arg3: memref<32x1xf32, #tpu.memory_space<vmem>>, %arg4: memref<1x8x256xf32, #tpu.memory_space<vmem>>, %arg5: memref<1x8x256xf32, #tpu.memory_space<vmem>>, %arg6: memref<1x8x256xf32, #tpu.memory_space<vmem>>) attributes {dimension_semantics = [#tpu.dimension_semantics<parallel>], iteration_bounds = array<i64: 2>, scalar_prefetch = 0 : i64, scratch_operands = 0 : i64, tpu.core_type = #tpu.core_type<tc>, window_params = [{transform_indices = @transform_0, window_bounds = array<i64: 1, 108, 256>}, {pipeline_mode = #tpu.pipeline_mode<synchronous>, transform_indices = @transform_1, window_bounds = array<i64: 32, 108>}, {pipeline_mode = #tpu.pipeline_mode<synchronous>, transform_indices = @transform_2, window_bounds = array<i64: 32, 1>}, {transform_indices = @transform_3, window_bounds = array<i64: 1, 8, 256>}, {transform_indices = @transform_4, window_bounds = array<i64: 1, 8, 256>}, {transform_indices = @transform_5, window_bounds = array<i64: 1, 8, 256>}]} {
    %c0 = arith.constant 0 : index
    %c0_0 = arith.constant 0 : index
    %0 = vector.load %arg2[%c0, %c0_0] : memref<32x108xf32, #tpu.memory_space<vmem>>, vector<32x108xf32>
    %c0_1 = arith.constant 0 : index
    %c0_2 = arith.constant 0 : index
    %c0_3 = arith.constant 0 : index
    %1 = vector.load %arg1[%c0_1, %c0_2, %c0_3] : memref<1x108x256xf32, #tpu.memory_space<vmem>>, vector<1x108x256xf32>
    %2 = vector.shape_cast %1 : vector<1x108x256xf32> to vector<108x256xf32>
    %cst = arith.constant dense<0.000000e+00> : vector<32x256xf32>
    %3 = tpu.matmul %0, %2, %cst {dimension_numbers = #tpu.dot_dimension_numbers<[1], [0], [0], [1], [0, 0, 1, 1], [], []>} : vector<32x108xf32>, vector<108x256xf32>, vector<32x256xf32> -> vector<32x256xf32>
    %c0_4 = arith.constant 0 : index
    %c0_5 = arith.constant 0 : index
    %4 = vector.load %arg3[%c0_4, %c0_5] : memref<32x1xf32, #tpu.memory_space<vmem>>, vector<32x1xf32>
    %5 = vector.broadcast %4 : vector<32x1xf32> to vector<32x256xf32>
    %6 = arith.addf %3, %5 : vector<32x256xf32>
    %7 = vector.extract_strided_slice %6 {offsets = [0, 0], sizes = [24, 256], strides = [1, 1]} : vector<32x256xf32> to vector<24x256xf32>
    %8 = arith.negf %7 : vector<24x256xf32>
    %9 = math.exp %8 : vector<24x256xf32>
    %cst_6 = arith.constant 1.000000e+00 : f32
    %10 = vector.broadcast %cst_6 : f32 to vector<24x256xf32>
    %11 = arith.addf %10, %9 : vector<24x256xf32>
    %12 = arith.divf %10, %11 : vector<24x256xf32>
    %13 = vector.extract_strided_slice %12 {offsets = [0, 0], sizes = [8, 256], strides = [1, 1]} : vector<24x256xf32> to vector<8x256xf32>
    %14 = vector.extract_strided_slice %12 {offsets = [8, 0], sizes = [8, 256], strides = [1, 1]} : vector<24x256xf32> to vector<8x256xf32>
    %15 = vector.extract_strided_slice %12 {offsets = [16, 0], sizes = [8, 256], strides = [1, 1]} : vector<24x256xf32> to vector<8x256xf32>
    %16 = vector.extract_strided_slice %6 {offsets = [24, 0], sizes = [8, 256], strides = [1, 1]} : vector<32x256xf32> to vector<8x256xf32>
    %17 = math.tanh %16 : vector<8x256xf32>
    %c0_7 = arith.constant 0 : index
    %c0_8 = arith.constant 0 : index
    %c0_9 = arith.constant 0 : index
    %18 = vector.load %arg4[%c0_7, %c0_8, %c0_9] : memref<1x8x256xf32, #tpu.memory_space<vmem>>, vector<1x8x256xf32>
    %19 = vector.shape_cast %18 : vector<1x8x256xf32> to vector<8x256xf32>
    %20 = arith.mulf %14, %19 : vector<8x256xf32>
    %21 = arith.mulf %13, %17 : vector<8x256xf32>
    %22 = arith.addf %20, %21 : vector<8x256xf32>
    %23 = math.tanh %22 : vector<8x256xf32>
    %24 = arith.mulf %15, %23 : vector<8x256xf32>
    %c0_10 = arith.constant 0 : index
    %c0_11 = arith.constant 0 : index
    %c0_12 = arith.constant 0 : index
    %25 = vector.load %arg5[%c0_10, %c0_11, %c0_12] : memref<1x8x256xf32, #tpu.memory_space<vmem>>, vector<1x8x256xf32>
    %26 = vector.shape_cast %25 : vector<1x8x256xf32> to vector<8x256xf32>
    %27 = vector.shape_cast %24 : vector<8x256xf32> to vector<1x8x256xf32>
    tpu.vector_store %arg5[%c0_10, %c0_11, %c0_12], %27 {strides = array<i32>} : memref<1x8x256xf32, #tpu.memory_space<vmem>>, vector<1x8x256xf32>,
    %c0_13 = arith.constant 0 : index
    %c0_14 = arith.constant 0 : index
    %c0_15 = arith.constant 0 : index
    %28 = vector.load %arg6[%c0_13, %c0_14, %c0_15] : memref<1x8x256xf32, #tpu.memory_space<vmem>>, vector<1x8x256xf32>
    %29 = vector.shape_cast %28 : vector<1x8x256xf32> to vector<8x256xf32>
    %30 = vector.shape_cast %22 : vector<8x256xf32> to vector<1x8x256xf32>
    tpu.vector_store %arg6[%c0_13, %c0_14, %c0_15], %30 {strides = array<i32>} : memref<1x8x256xf32, #tpu.memory_space<vmem>>, vector<1x8x256xf32>,
    return
  }
  func.func @transform_0(%arg0: i32) -> (i32, i32, i32) {
    %c0_i32 = arith.constant 0 : i32
    %c0_i32_0 = arith.constant 0 : i32
    %c0_i32_1 = arith.constant 0 : i32
    return %arg0, %c0_i32, %c0_i32_0 : i32, i32, i32
  }
  func.func @transform_1(%arg0: i32) -> (i32, i32) {
    %c0_i32 = arith.constant 0 : i32
    %c0_i32_0 = arith.constant 0 : i32
    %c0_i32_1 = arith.constant 0 : i32
    return %c0_i32, %c0_i32_0 : i32, i32
  }
  func.func @transform_2(%arg0: i32) -> (i32, i32) {
    %c0_i32 = arith.constant 0 : i32
    %c0_i32_0 = arith.constant 0 : i32
    %c0_i32_1 = arith.constant 0 : i32
    return %c0_i32, %c0_i32_0 : i32, i32
  }
  func.func @transform_3(%arg0: i32) -> (i32, i32, i32) {
    %c0_i32 = arith.constant 0 : i32
    %c0_i32_0 = arith.constant 0 : i32
    %c0_i32_1 = arith.constant 0 : i32
    return %arg0, %c0_i32, %c0_i32_0 : i32, i32, i32
  }
  func.func @transform_4(%arg0: i32) -> (i32, i32, i32) {
    %c0_i32 = arith.constant 0 : i32
    %c0_i32_0 = arith.constant 0 : i32
    %c0_i32_1 = arith.constant 0 : i32
    return %arg0, %c0_i32, %c0_i32_0 : i32, i32, i32
  }
  func.func @transform_5(%arg0: i32) -> (i32, i32, i32) {
    %c0_i32 = arith.constant 0 : i32
    %c0_i32_0 = arith.constant 0 : i32
    %c0_i32_1 = arith.constant 0 : i32
    return %arg0, %c0_i32, %c0_i32_0 : i32, i32, i32
  }
}

</mosaic_0001>

<bundles_post_ra>
// kernel: convlstm_cell_pallas.1
= control target key start
LH: loop header
LB: loop body
LE: loop exit
PB: predicated region body
PF: predicated region fallthrough
CT: control target
= control target key end

     0   :  { %s737_s18 = smov 0   ;;  %s827_s0 = inlined_call_operand.vmem [shape: f32[2,108,256], index: 0, kind: input, shape index: {}]   ;;  %s828_s1 = inlined_call_operand.vmem [shape: f32[32,108], index: 1, kind: input, shape index: {}]   ;;  %s829_s2 = inlined_call_operand.vmem [shape: f32[32,1], index: 2, kind: input, shape index: {}]   ;;  %s830_s3 = inlined_call_operand.vmem [shape: f32[2,8,256], index: 3, kind: input, shape index: {}, may-alias: {3,5}]   ;;  %s831_s4 = inlined_call_operand.vmem [shape: f32[2,8,256], index: 4, kind: output, shape index: {0}]   ;;  %s832_s5 = inlined_call_operand.vmem [shape: f32[2,8,256], index: 5, kind: output, shape index: {1}, may-alias: {3,5}]  }
   0x1 LB: > { %s577_s19 = sadd.s32 4294967295, %s702_s18   ;;  %p581_p0 = scmp.ge.s32.totalorder %s702_s18, 1  ;;  %s702_s18 = sphi %s737_s18, %s16_s18  }
   0x2   : > { %p200_p1 = scmp.lt.s32.totalorder %s702_s18, 3 }
   0x4   : > { %p201_p2 = pnand %p581_p0, %p200_p1 }
   0x5   : > { %p238_p3 = scmp.lt.s32.totalorder (!%p201_p2), %s577_s19, 1  ;;  %v704_v0 = vmov (!%p201_p2), 0.0   ;;  %v705_v1 = vmov (!%p201_p2), 0   ;;  %v290_v2 = vld [vmem:[%s829_s2] sm:$0xff] (!%p201_p2)  ;;  %v292_v3 = vld [vmem:[%s829_s2 + $0x10] sm:$0xff] (!%p201_p2)  ;;  %v291_v4 = vld [vmem:[%s829_s2 + $0x8] sm:$0xff] (!%p201_p2) }
   0x6   : > { %204 = sbr.rel (%p201_p2) target bundleno = 311 (0x137), region = 36  ;;  %398 = vmatprep.mubr.f32.mxu0 (!%p201_p2), %v704_v0  ;;  %410 = vmatprep.mubr.f32.mxu1 (!%p201_p2), %v704_v0  ;;  %v293_v5 = vld [vmem:[%s829_s2 + $0x18] sm:$0xff] (!%p201_p2)  ;;  %vm327_vm0 = vcmask (!%p201_p2), 1043456   ;;  %vm706_vm1 = vmmov (!%p201_p2), 1   ;;  %v258_v48 = vld [vmem:[%s828_s1] sm:$0xff] (!%p201_p2)  ;;  %vm314_vm3 = vcmask (!%p201_p2), 883712  }
   0x7   : > { %662 = vset.pattern.permute.xlu0 (!%p201_p2), %v705_v1  ;;  %663 = vset.pattern.permute.xlu1 (!%p201_p2), %v705_v1  ;;  %vm631_vm2 = vmpackc.low (!%p201_p2), %vm327_vm0, %vm706_vm1  ;;  %v260_v49 = vld [vmem:[%s828_s1 + $0x10] sm:$0xff] (!%p201_p2)  ;;  %v259_v50 = vld [vmem:[%s828_s1 + $0x8] sm:$0xff] (!%p201_p2) }
   0x8   : > { %296 = vperm.xlu0 (!%p201_p2), %662, %v290_v2   ;;  %306 = vperm.xlu1 (!%p201_p2), %663, %v292_v3   ;;  %v261_v51 = vld [vmem:[%s828_s1 + $0x18] sm:$0xff] (!%p201_p2) }
   0xc   : > { %301 = vperm.xlu0 (!%p201_p2), %662, %v291_v4   ;;  %311 = vperm.xlu1 (!%p201_p2), %663, %v293_v5  }
   0xd   : > { %s834_s19 = smov (!%p238_p3, %s577_s19), 1 }
   0xe   : > { %s650_s24 = smul.u32 224, %s834_s19  ;;  %s810_s15 = sshll.u32 %s834_s19, 4 }
   0xf   : > { %s247_s20 = scalar_lea.vmem %s830_s3, %s810_s15  ;;  %s257_s22 = scalar_lea.vmem %s832_s5, %s810_s15 }
  0x10   : > { %s765_s6 = scalar_lea.vmem %s827_s0, %s650_s24  ;;  %s252_s25 = scalar_lea.vmem %s831_s4, %s810_s15 }
  0x11   : > { %v263_v6 = vld [vmem:[%s765_s6 + $0x8] sm:$0xff]  ;;  %v265_v7 = vld [vmem:[%s765_s6 + $0x18] sm:$0xff]  ;;  %v262_v8 = vld [vmem:[%s765_s6] sm:$0xff] }
  0x12   : > { %v606_v9 = vpack.c.bf16 %v265_v7, %v263_v6  ;;  %v264_v10 = vld [vmem:[%s765_s6 + $0x10] sm:$0xff]  ;;  %v267_v11 = vld [vmem:[%s765_s6 + $0x28] sm:$0xff]  ;;  %v269_v12 = vld [vmem:[%s765_s6 + $0x38] sm:$0xff] }
  0x13   : > { %v608_v13 = vpack.c.bf16 %v264_v10, %v262_v8  ;;  %v610_v14 = vpack.c.bf16 %v269_v12, %v267_v11  ;;  %v266_v15 = vld [vmem:[%s765_s6 + $0x20] sm:$0xff]  ;;  %v268_v16 = vld [vmem:[%s765_s6 + $0x30] sm:$0xff]  ;;  %v271_v17 = vld [vmem:[%s765_s6 + $0x48] sm:$0xff] }
  0x14   : > { %607 = vmatprep.subr.bf16.mxu0 %v606_v9  ;;  %v273_v18 = vld [vmem:[%s765_s6 + $0x58] sm:$0xff]  ;;  %636 = vmatprep.subr.bf16.mxu1 %v606_v9  ;;  %v612_v19 = vpack.c.bf16 %v268_v16, %v266_v15  ;;  %v270_v21 = vld [vmem:[%s765_s6 + $0x40] sm:$0xff]  ;;  %v272_v22 = vld [vmem:[%s765_s6 + $0x50] sm:$0xff] }
  0x15   : > { %609 = vmatpush1.bf16.msra.mxu0 %v608_v13  ;;  %643 = vmatpush1.bf16.msra.mxu1 %v608_v13  ;;  %v614_v20 = vpack.c.bf16 %v273_v18, %v271_v17  ;;  %v275_v23 = vld [vmem:[%s765_s6 + $0x68] sm:$0xff]  ;;  %v277_v24 = vld [vmem:[%s765_s6 + $0x78] sm:$0xff]  ;;  %v616_v25 = vpack.c.bf16 %v272_v22, %v270_v21  ;;  %v274_v27 = vld [vmem:[%s765_s6 + $0x60] sm:$0xff] }
  0x16   : > { %611 = vmatprep.subr.bf16.mxu0 %v610_v14  ;;  %637 = vmatprep.subr.bf16.mxu1 %v610_v14  ;;  %v618_v26 = vpack.c.bf16 %v277_v24, %v275_v23  ;;  %v276_v28 = vld [vmem:[%s765_s6 + $0x70] sm:$0xff]  ;;  %v279_v29 = vld [vmem:[%s765_s6 + $0x88] sm:$0xff]  ;;  %v281_v30 = vld [vmem:[%s765_s6 + $0x98] sm:$0xff] }
  0x17   : > { %v620_v31 = vpack.c.bf16 %v276_v28, %v274_v27  ;;  %v622_v32 = vpack.c.bf16 %v281_v30, %v279_v29  ;;  %v278_v33 = vld [vmem:[%s765_s6 + $0x80] sm:$0xff]  ;;  %v280_v34 = vld [vmem:[%s765_s6 + $0x90] sm:$0xff]  ;;  %v283_v35 = vld [vmem:[%s765_s6 + $0xa8] sm:$0xff] }
  0x18   : > { %v285_v36 = vld [vmem:[%s765_s6 + $0xb8] sm:$0xff]  ;;  %v624_v37 = vpack.c.bf16 %v280_v34, %v278_v33  ;;  %v282_v39 = vld [vmem:[%s765_s6 + $0xa0] sm:$0xff]  ;;  %v284_v40 = vld [vmem:[%s765_s6 + $0xb0] sm:$0xff] }
  0x19   : > { %613 = vmatpush1.bf16.msra.mxu0 %v612_v19  ;;  %644 = vmatpush1.bf16.msra.mxu1 %v612_v19  ;;  %v626_v38 = vpack.c.bf16 %v285_v36, %v283_v35  ;;  %v287_v41 = vld [vmem:[%s765_s6 + $0xc8] sm:$0xff]  ;;  %v289_v42 = vld [vmem:[%s765_s6 + $0xd8] sm:$0xf]  ;;  %v628_v43 = vpack.c.bf16 %v284_v40, %v282_v39  ;;  %v286_v45 = vld [vmem:[%s765_s6 + $0xc0] sm:$0xff] }
  0x1a   : > { %615 = vmatprep.subr.bf16.mxu0 %v614_v20  ;;  %638 = vmatprep.subr.bf16.mxu1 %v614_v20  ;;  %v630_v44 = vpack.c.bf16 %v289_v42, %v287_v41  ;;  %v288_v46 = vld [vmem:[%s765_s6 + $0xd0] sm:$0xf]  ;;  %v461_v29 = vld [vmem:[%s247_s20] sm:$0xff] }
  0x1b   : > { %v633_v47 = vpack.c.bf16 %v288_v46, %v286_v45 }
  0x1d   : > { %617 = vmatpush1.bf16.msra.mxu0 %v616_v25  ;;  %645 = vmatpush1.bf16.msra.mxu1 %v616_v25 }
  0x1e   : > { %619 = vmatprep.subr.bf16.mxu0 %v618_v26  ;;  %639 = vmatprep.subr.bf16.mxu1 %v618_v26 }
  0x21   : > { %621 = vmatpush1.bf16.msra.mxu0 %v620_v31  ;;  %646 = vmatpush1.bf16.msra.mxu1 %v620_v31  ;;  %v462_v31 = vld [vmem:[%s247_s20 + $0x8] sm:$0xff] }
  0x22   : > { %623 = vmatprep.subr.bf16.mxu0 %v622_v32  ;;  %640 = vmatprep.subr.bf16.mxu1 %v622_v32 }
  0x25   : > { %625 = vmatpush1.bf16.msra.mxu0 %v624_v37  ;;  %647 = vmatpush1.bf16.msra.mxu1 %v624_v37 }
  0x26   : > { %627 = vmatprep.subr.bf16.mxu0 %v626_v38  ;;  %641 = vmatprep.subr.bf16.mxu1 %v626_v38 }
  0x29   : > { %629 = vmatpush1.bf16.msra.mxu0 %v628_v43  ;;  %648 = vmatpush1.bf16.msra.mxu1 %v628_v43 }
  0x2a   : > { %632 = vmatprep.subr.msk.bf16.mxu0 %vm631_vm2, %v630_v44  ;;  %642 = vmatprep.subr.msk.bf16.mxu1 %vm631_vm2, %v630_v44 }
  0x2d   : > { %635 = vmatpush1.bf16.msk.msra.mxu0 %vm631_vm2, %v633_v47  ;;  %649 = vmatpush1.bf16.msk.msra.mxu1 %vm631_vm2, %v633_v47 }
  0x30   : > { %591 = vmatmul.mubr.msk.f32.vlgmr.msra.gmra.mrb[0].mxu0 %vm314_vm3, %v258_v48  ;;  %593 = vmatmul.mubr.msk.f32.vlgmr.msra.gmra.mrb[0].mxu1 %vm314_vm3, %v260_v49 }
  0x31   : > { %404 = vmatprep.mubr.f32.mxu0 %v704_v0  ;;  %416 = vmatprep.mubr.f32.mxu1 %v704_v0 }
  0x34   : > { %592 = vmatmul.mubr.msk.f32.gmra.mrb[2].mxu0 %vm314_vm3, %v259_v50  ;;  %594 = vmatmul.mubr.msk.f32.gmra.mrb[2].mxu1 %vm314_vm3, %v261_v51 }
  0x87   : > { %v297_v52 = vpop.permute.xlu0 %296  ;;  %v307_v61 = vpop.permute.xlu1 %306 }
  0x8b   : > { %v302_v60 = vpop.permute.xlu0 %301  ;;  %v312_v9 = vpop.permute.xlu1 %311 }
 0x103   : > { %v400_v53 = vpop.f32.mrb[0].mxu0  ;;  %v412_v54 = vpop.f32.mrb[0].mxu1 }
 0x104   : > { %v401_v55 = vadd.f32 %v400_v53, %v297_v52  ;;  %v402_v56 = vpop.f32.mrb[1].mxu0  ;;  %v414_v57 = vpop.f32.mrb[1].mxu1  ;;  %v413_v5 = vadd.f32 %v412_v54, %v307_v61 }
 0x105   : > { %v403_v58 = vadd.f32 %v402_v56, %v297_v52  ;;  %v415_v7 = vadd.f32 %v414_v57, %v307_v61 }
 0x106   : > { %v595_v59 = vmul.f32 -1.442695, %v401_v55  ;;  %v599_v10 = vmul.f32 -1.442695, %v413_v5 }
 0x107   : > { %v596_v62 = vmul.f32 -1.442695, %v403_v58  ;;  %v406_v63 = vpop.f32.mrb[2].mxu0  ;;  %v418_v1 = vpop.f32.mrb[2].mxu1  ;;  %v600_v11 = vmul.f32 -1.442695, %v415_v7 }
 0x108   : > { %664 = vpow2.f32 %v595_v59  ;;  %v407_v0 = vadd.f32 %v406_v63, %v302_v60  ;;  %v408_v2 = vpop.f32.mrb[3].mxu0  ;;  %v420_v3 = vpop.f32.mrb[3].mxu1  ;;  %v419_v12 = vadd.f32 %v418_v1, %v312_v9 }
 0x109   : > { %666 = vpow2.f32 %v596_v62  ;;  %v409_v4 = vadd.f32 %v408_v2, %v302_v60  ;;  %v421_v13 = vadd.f32 %v420_v3, %v312_v9 }
 0x10a   : > { %v597_v6 = vmul.f32 -1.442695, %v407_v0 }
 0x10b   : > { %v598_v8 = vmul.f32 -1.442695, %v409_v4 }
 0x10c   : > { %668 = vpow2.f32 %v597_v6 }
 0x10d   : > { %670 = vpow2.f32 %v598_v8 }
 0x10e   : > { %672 = vpow2.f32 %v599_v10 }
 0x10f   : > { %674 = vpow2.f32 %v600_v11 }
 0x110   : > { %676 = vtanh.f32 %v419_v12 }
 0x111   : > { %678 = vtanh.f32 %v421_v13 }
 0x112   : > { %v665_v14 = vpop.eup %664 }
 0x113   : > { %v667_v15 = vpop.eup %666  ;;  %v441_v16 = vadd.f32 1.0, %v665_v14 }
 0x114   : > { %v442_v17 = vadd.f32 1.0, %v667_v15 }
 0x115   : > { %680 = vrcp.f32 %v441_v16 }
 0x116   : > { %v669_v18 = vpop.eup %668  ;;  %682 = vrcp.f32 %v442_v17 }
 0x117   : > { %v671_v19 = vpop.eup %670  ;;  %v443_v20 = vadd.f32 1.0, %v669_v18 }
 0x118   : > { %v444_v21 = vadd.f32 1.0, %v671_v19  ;;  %v673_v22 = vpop.eup %672 }
 0x119   : > { %684 = vrcp.f32 %v443_v20  ;;  %v675_v23 = vpop.eup %674  ;;  %v445_v32 = vadd.f32 1.0, %v673_v22 }
 0x11a   : > { %686 = vrcp.f32 %v444_v21  ;;  %v677_v24 = vpop.eup %676  ;;  %v446_v34 = vadd.f32 1.0, %v675_v23 }
 0x11b   : > { %v679_v25 = vpop.eup %678  ;;  %688 = vrcp.f32 %v445_v32 }
 0x11c   : > { %690 = vrcp.f32 %v446_v34 }
 0x11f   : > { %v681_v26 = vpop.eup %680 }
 0x120   : > { %v683_v27 = vpop.eup %682  ;;  %v465_v28 = vmul.f32 %v681_v26, %v677_v24 }
 0x121   : > { %v466_v30 = vmul.f32 %v683_v27, %v679_v25 }
 0x123   : > { %v685_v33 = vpop.eup %684 }
 0x124   : > { %v687_v35 = vpop.eup %686  ;;  %v463_v36 = vmul.f32 %v685_v33, %v461_v29 }
 0x125   : > { %v464_v37 = vmul.f32 %v687_v35, %v462_v31  ;;  %v689_v40 = vpop.eup %688 }
 0x126   : > { %v467_v38 = vadd.f32 %v465_v28, %v463_v36  ;;  %v691_v41 = vpop.eup %690 }
 0x127   : > { %v468_v39 = vadd.f32 %v466_v30, %v464_v37 }
 0x128   : > { %692 = vtanh.f32 %v467_v38  ;;  %475 = vst [vmem:[%s257_s22] sm:$0xff] %v467_v38 }
 0x129   : > { %694 = vtanh.f32 %v468_v39  ;;  %476 = vst [vmem:[%s257_s22 + $0x8] sm:$0xff] %v468_v39 }
 0x132   : > { %v693_v42 = vpop.eup %692 }
 0x133   : > { %v695_v43 = vpop.eup %694  ;;  %v471_v44 = vmul.f32 %v693_v42, %v689_v40 }
 0x134   : > { %v472_v45 = vmul.f32 %v695_v43, %v691_v41 }
 0x135   : > { %473 = vst [vmem:[%s252_s25] sm:$0xff] %v471_v44 }
 0x136   : > { %474 = vst [vmem:[%s252_s25 + $0x8] sm:$0xff] %v472_v45 }
 0x137 PF: > { %s16_s18 = sadd.s32 1, %s702_s18  }
 0x138   : > { %p13_p4 = scmp.ge.s32.totalorder %s16_s18, 4  }
 0x13a   :  { %15 = sbr.rel (!%p13_p4) target bundleno = 1 (0x1), region = 81 }

</bundles_post_ra>
